<compile_context>
chip_gen: v6e
topology: v6e:2x2x1
jax: 0.10.0
libtpu: 0.0.40
codegen_flags: <defaults>
</compile_context>

<pallas_src>
import math

import jax
import jax.numpy as jnp
from jax import lax
from jax.experimental import pallas as pl
from jax.experimental.pallas import tpu as pltpu


def _round_up(a: int, b: int) -> int:
    return (a + b - 1) // b * b


def _vmem_capacity_bytes() -> int:
    """Per-core VMEM capacity; conservative 64 MiB (v7x) fallback."""
    try:
        return int(pltpu.get_tpu_info().vmem_capacity_bytes)
    except Exception:
        return 64 * 1024 * 1024


# ---------------------------------------------------------------------------
# Kernels
# ---------------------------------------------------------------------------

def _proj_kernel_resident(x_ref, w_ref, b_ref, o_ref):
    # x_ref: (m_pad, k_pad) resident across the whole grid.
    # w_ref: (tn, k_pad) in native nn.Linear layout -> contract last dims (NT).
    # b_ref: (1, tn) f32.  o_ref: (m_pad, tn).
    acc = lax.dot_general(
        x_ref[...], w_ref[...],
        dimension_numbers=(((1,), (1,)), ((), ())),
        preferred_element_type=jnp.float32)
    o_ref[...] = (acc + b_ref[...]).astype(o_ref.dtype)


def _proj_kernel_ktiled(x_ref, w_ref, b_ref, o_ref, acc_ref):
    # x_ref: (tm, tk), w_ref: (tn, tk) native layout, b_ref: (1, tn) f32,
    # o_ref: (tm, tn), acc_ref: (tm, tn) f32 carried across the K axis.
    k = pl.program_id(2)

    @pl.when(k == 0)
    def _init():
        acc_ref[...] = jnp.zeros_like(acc_ref)

    acc_ref[...] += lax.dot_general(
        x_ref[...], w_ref[...],
        dimension_numbers=(((1,), (1,)), ((), ())),
        preferred_element_type=jnp.float32)

    @pl.when(k == pl.num_programs(2) - 1)
    def _finalize():
        o_ref[...] = (acc_ref[...] + b_ref[...]).astype(o_ref.dtype)


# ---------------------------------------------------------------------------
# Wrapper
# ---------------------------------------------------------------------------

def projection_layer(x, weight, bias, *, tm=512, tn=512, tk=1024,
                     compute_dtype=jnp.bfloat16, out_dtype=None,
                     allow_resident=True, auto_tile=True):
    """x: (..., d_h); weight: (vocab, d_h) (nn.Linear layout); bias: (vocab,).

    compute_dtype defaults to bfloat16 (f32 accumulation is always used).
    Production callers should store `weight` already in compute_dtype so the
    wrapper does no per-call O(vocab*d_h) cast.
    """
    *lead, d_h = x.shape
    vocab, d_h_w = weight.shape
    assert d_h == d_h_w and bias.shape == (vocab,)

    compute_dtype = jnp.dtype(compute_dtype)
    out_dtype = jnp.dtype(out_dtype or x.dtype)
    M = math.prod(lead) if lead else 1

    isz = compute_dtype.itemsize
    osz = out_dtype.itemsize
    # Minimum sublane tile: 8 (4-byte), 16 (2-byte), 32 (1-byte) dtypes.
    sub_min = {1: 32, 2: 16, 4: 8}.get(isz, 8)

    # Lane/sublane-legal base extents.
    m_base = _round_up(max(M, 1), sub_min)
    k_base = _round_up(d_h, 128)
    n_base = _round_up(vocab, 128)

    vmem_cap = _vmem_capacity_bytes()
    budget = int(vmem_cap * 0.75)

    # ---- Resident-x fast path -------------------------------------------
    def _resident_bytes(tn_):
        return (2 * m_base * k_base * isz          # x (counted double-buffered)
                + 2 * tn_ * k_base * isz           # W strip, double-buffered
                + 2 * tn_ * 4                      # bias
                + 2 * m_base * tn_ * osz)          # output tile, double-buffered

    tn_res = None
    if allow_resident and 2 * m_base * k_base * isz <= budget // 2:
        for cand in (_round_up(tn, 128), 512, 256, 128):
            c = min(max(cand, 128), n_base)
            if _resident_bytes(c) <= budget:
                tn_res = c
                break
    use_resident = tn_res is not None

    if use_resident:
        tm_e, tk_e, tn_e = m_base, k_base, tn_res
        m_pad, k_pad = m_base, k_base
        n_pad = _round_up(n_base, tn_e)
        vmem_need = _resident_bytes(tn_e)
    else:
        # ---- K-tiled fallback (large M) ----------------------------------
        tm_e = min(_round_up(tm, sub_min), m_base)
        tn_e = min(_round_up(tn, 128), n_base)
        tk_e = min(_round_up(tk, 128), k_base)

        def _step_bytes(tm_, tn_, tk_):
            return (2 * (tm_ * tk_ + tn_ * tk_) * isz   # x + W, double-buffered
                    + 2 * tn_ * 4                       # bias
                    + 2 * tm_ * tn_ * osz               # output tile
                    + tm_ * tn_ * 4)                    # f32 accumulator scratch

        if auto_tile:
            # Grow K first (fewer grid steps), then M (fewer W re-streams).
            while tk_e < k_base and \
                    _step_bytes(tm_e, tn_e, min(tk_e * 2, k_base)) <= budget:
                tk_e = min(tk_e * 2, k_base)
            while tm_e < m_base and \
                    _step_bytes(min(tm_e * 2, m_base), tn_e, tk_e) <= budget:
                tm_e = min(tm_e * 2, m_base)
            # Shrink if over budget (v7x has half the VMEM of v5e/v6e).
            while _step_bytes(tm_e, tn_e, tk_e) > budget:
                if tk_e > 256:
                    tk_e = max(_round_up(tk_e // 2, 128), 256)
                elif tn_e > 256:
                    tn_e = max(_round_up(tn_e // 2, 128), 256)
                elif tm_e > sub_min:
                    tm_e = max(_round_up(tm_e // 2, sub_min), sub_min)
                else:
                    break

        m_pad = _round_up(m_base, tm_e)
        k_pad = _round_up(k_base, tk_e)
        n_pad = _round_up(n_base, tn_e)
        vmem_need = _step_bytes(tm_e, tn_e, tk_e)

    # ---- Operand prep (no transpose; pad/cast only when required) --------
    x2d = x.reshape(M, d_h)
    if x2d.dtype != compute_dtype:
        x2d = x2d.astype(compute_dtype)
    if (m_pad, k_pad) != (M, d_h):
        x2d = jnp.pad(x2d, ((0, m_pad - M), (0, k_pad - d_h)))

    w = weight
    if w.dtype != compute_dtype:
        # Per-call cast; store W in compute_dtype upstream to avoid this copy.
        w = w.astype(compute_dtype)
    if (n_pad, k_pad) != (vocab, d_h):
        w = jnp.pad(w, ((0, n_pad - vocab), (0, k_pad - d_h)))

    b2d = bias.astype(jnp.float32).reshape(1, vocab)
    if n_pad != vocab:
        b2d = jnp.pad(b2d, ((0, 0), (0, n_pad - vocab)))

    # ---- VMEM limit & cost estimate ---------------------------------------
    vmem_limit = int(min(max(vmem_need + (vmem_need >> 2), 32 * 1024 * 1024),
                         int(vmem_cap * 0.9)))
    vmem_limit = max(vmem_limit, min(vmem_need, int(vmem_cap * 0.95)))

    x_bytes = m_pad * k_pad * isz
    w_bytes = n_pad * k_pad * isz
    b_bytes = n_pad * 4
    o_bytes = m_pad * n_pad * osz
    if use_resident:
        bytes_accessed = x_bytes + w_bytes + b_bytes + o_bytes
    else:
        bytes_accessed = (x_bytes * (n_pad // tn_e)
                          + (w_bytes + b_bytes) * (m_pad // tm_e)
                          + o_bytes)
    cost = pl.CostEstimate(flops=2 * M * d_h * vocab, transcendentals=0,
                           bytes_accessed=int(bytes_accessed))

    # ---- pallas_call -------------------------------------------------------
    if use_resident:
        out2d = pl.pallas_call(
            _proj_kernel_resident,
            out_shape=jax.ShapeDtypeStruct((m_pad, n_pad), out_dtype),
            grid=(n_pad // tn_e,),
            in_specs=[
                pl.BlockSpec((m_pad, k_pad), lambda j: (0, 0)),   # x (resident)
                pl.BlockSpec((tn_e, k_pad), lambda j: (j, 0)),    # W strip
                pl.BlockSpec((1, tn_e), lambda j: (0, j)),        # bias
            ],
            out_specs=pl.BlockSpec((m_pad, tn_e), lambda j: (0, j)),
            compiler_params=pltpu.CompilerParams(
                dimension_semantics=("parallel",),
                vmem_limit_bytes=vmem_limit,
            ),
            cost_estimate=cost,
        )(x2d, w, b2d)
    else:
        grid = (m_pad // tm_e, n_pad // tn_e, k_pad // tk_e)
        # TODO(synk): if profiling shows exposed W DMA here, sweep
        # pipeline_mode=pl.Buffered(3) on the W BlockSpec where VMEM allows.
        out2d = pl.pallas_call(
            _proj_kernel_ktiled,
            out_shape=jax.ShapeDtypeStruct((m_pad, n_pad), out_dtype),
            grid=grid,
            in_specs=[
                pl.BlockSpec((tm_e, tk_e), lambda i, j, k: (i, k)),  # x tile
                pl.BlockSpec((tn_e, tk_e), lambda i, j, k: (j, k)),  # W tile (native)
                pl.BlockSpec((1, tn_e), lambda i, j, k: (0, j)),     # bias
            ],
            out_specs=pl.BlockSpec((tm_e, tn_e), lambda i, j, k: (i, j)),
            scratch_shapes=[pltpu.VMEM((tm_e, tn_e), jnp.float32)],
            compiler_params=pltpu.CompilerParams(
                dimension_semantics=("parallel", "parallel", "arbitrary"),
                vmem_limit_bytes=vmem_limit,
            ),
            cost_estimate=cost,
        )(x2d, w, b2d)

    return out2d[:M, :vocab].reshape(*lead, vocab)


# ---------------------------------------------------------------------------
# Demo / correctness check
# ---------------------------------------------------------------------------

if __name__ == "__main__":
    # Small shapes consistent with a Linear(d_h, vocab_size) projection head.
    batch, seq, d_h, vocab = 2, 8, 256, 384

    key = jax.random.PRNGKey(0)
    kx, kw, kb = jax.random.split(key, 3)

    x = jax.random.normal(kx, (batch, seq, d_h), dtype=jnp.float32)

    # Deterministic init mimicking nn.Linear's U(-1/sqrt(d_h), 1/sqrt(d_h)).
    bound = 1.0 / math.sqrt(d_h)
    weight = jax.random.uniform(kw, (vocab, d_h), minval=-bound, maxval=bound,
                                dtype=jnp.float32)
    bias = jax.random.uniform(kb, (vocab,), minval=-bound, maxval=bound,
                              dtype=jnp.float32)

    ref = x @ weight.T + bias

    # 1) Default (bf16 MXU operands, f32 accumulation) -- resident-x path.
    out_bf16 = jax.block_until_ready(projection_layer(x, weight, bias))
    assert out_bf16.shape == (batch, seq, vocab)
    assert jnp.allclose(out_bf16, ref, atol=5e-2, rtol=5e-2), \
        float(jnp.max(jnp.abs(out_bf16 - ref)))

    # 2) f32 compute, resident-x path -- tight tolerance vs. reference.
    out_f32 = jax.block_until_ready(
        projection_layer(x, weight, bias, compute_dtype=jnp.float32))
    assert jnp.allclose(out_f32, ref, atol=1e-4, rtol=1e-4), \
        float(jnp.max(jnp.abs(out_f32 - ref)))

    # 3) Force the K-tiled fallback (grid (1, 3, 2)) to exercise the
    #    accumulator + bias-on-last-K path used at large M.
    out_kt = jax.block_until_ready(
        projection_layer(x, weight, bias, compute_dtype=jnp.float32,
                         allow_resident=False, auto_tile=False,
                         tm=16, tn=128, tk=128))
    assert jnp.allclose(out_kt, ref, atol=1e-4, rtol=1e-4), \
        float(jnp.max(jnp.abs(out_kt - ref)))

    print("KERNEL_OK")
</pallas_src>

<mosaic_0001>
module attributes {stable_mosaic.version = 11 : i64} {
  func.func @_proj_kernel_resident(%arg0: i32, %arg1: memref<16x256xbf16, #tpu.memory_space<vmem>>, %arg2: memref<384x256xbf16, #tpu.memory_space<vmem>>, %arg3: memref<1x384xf32, #tpu.memory_space<vmem>>, %arg4: memref<16x384xf32, #tpu.memory_space<vmem>>) attributes {dimension_semantics = [#tpu.dimension_semantics<parallel>], iteration_bounds = array<i64: 1>, scalar_prefetch = 0 : i64, scratch_operands = 0 : i64, tpu.core_type = #tpu.core_type<tc>, window_params = [{pipeline_mode = #tpu.pipeline_mode<synchronous>, transform_indices = @transform_0, window_bounds = array<i64: 16, 256>}, {transform_indices = @transform_1, window_bounds = array<i64: 384, 256>}, {transform_indices = @transform_2, window_bounds = array<i64: 1, 384>}, {transform_indices = @transform_3, window_bounds = array<i64: 16, 384>}]} {
    %c0 = arith.constant 0 : index
    %c0_0 = arith.constant 0 : index
    %0 = vector.load %arg1[%c0, %c0_0] : memref<16x256xbf16, #tpu.memory_space<vmem>>, vector<16x256xbf16>
    %c0_1 = arith.constant 0 : index
    %c0_2 = arith.constant 0 : index
    %1 = vector.load %arg2[%c0_1, %c0_2] : memref<384x256xbf16, #tpu.memory_space<vmem>>, vector<384x256xbf16>
    %cst = arith.constant dense<0.000000e+00> : vector<16x384xf32>
    %2 = tpu.matmul %0, %1, %cst {dimension_numbers = #tpu.dot_dimension_numbers<[1], [1], [0], [0], [0, 0, 1, 0], [], []>} : vector<16x256xbf16>, vector<384x256xbf16>, vector<16x384xf32> -> vector<16x384xf32>
    %c0_3 = arith.constant 0 : index
    %c0_4 = arith.constant 0 : index
    %3 = vector.load %arg3[%c0_3, %c0_4] : memref<1x384xf32, #tpu.memory_space<vmem>>, vector<1x384xf32>
    %4 = vector.broadcast %3 : vector<1x384xf32> to vector<16x384xf32>
    %5 = arith.addf %2, %4 : vector<16x384xf32>
    %c0_5 = arith.constant 0 : index
    %c0_6 = arith.constant 0 : index
    %6 = vector.load %arg4[%c0_5, %c0_6] : memref<16x384xf32, #tpu.memory_space<vmem>>, vector<16x384xf32>
    tpu.vector_store %arg4[%c0_5, %c0_6], %5 {strides = array<i32>} : memref<16x384xf32, #tpu.memory_space<vmem>>, vector<16x384xf32>,
    return
  }
  func.func @transform_0(%arg0: i32) -> (i32, i32) {
    %c0_i32 = arith.constant 0 : i32
    %c0_i32_0 = arith.constant 0 : i32
    %c0_i32_1 = arith.constant 0 : i32
    return %c0_i32, %c0_i32_0 : i32, i32
  }
  func.func @transform_1(%arg0: i32) -> (i32, i32) {
    %c0_i32 = arith.constant 0 : i32
    %c0_i32_0 = arith.constant 0 : i32
    return %arg0, %c0_i32 : i32, i32
  }
  func.func @transform_2(%arg0: i32) -> (i32, i32) {
    %c0_i32 = arith.constant 0 : i32
    %c0_i32_0 = arith.constant 0 : i32
    return %c0_i32, %arg0 : i32, i32
  }
  func.func @transform_3(%arg0: i32) -> (i32, i32) {
    %c0_i32 = arith.constant 0 : i32
    %c0_i32_0 = arith.constant 0 : i32
    return %c0_i32, %arg0 : i32, i32
  }
}

</mosaic_0001>

<bundles_post_ra>
// kernel: tpu_custom_call.1
= control target key start
LH: loop header
LB: loop body
LE: loop exit
PB: predicated region body
PF: predicated region fallthrough
CT: control target
= control target key end

     0   :  { %8 = vsyncpa [#allocation3], 0  ;;  %s706_s0 = inlined_call_operand.hbm [shape: bf16[16,256], index: 0, kind: input, shape index: {}]   ;;  %s707_s1 = inlined_call_operand.hbm [shape: bf16[384,256], index: 1, kind: input, shape index: {}]   ;;  %s708_s2 = inlined_call_operand.vmem [shape: f32[1,384], index: 2, kind: input, shape index: {}]   ;;  %s709_s3 = inlined_call_operand.hbm [shape: f32[16,384], index: 3, kind: output, shape index: {}]  }
   0x1   :  { %9 = vsyncpa [#allocation6], 0 }
   0x2   :  { %10 = vsyncpa [#allocation4], 0  ;;  %s667_s12 = smov [#allocation2]  }
   0x3   :  { %s16_s13 = sshll.u32 %s667_s12, 4  ;;  %s17_s13 = int_to_ptr.vmem [resolvable:$true] %s16_s13 }
   0x4   :  { %s609_s14 = scalar_lea.vmem %s17_s13, 256  ;;  %p614_p1 = scmp.lt.s32.totalorder %s17_s13, %s17_s13 }
   0x5   :  { %p610_p0 = scmp.ne.s32.totalorder %s17_s13, %s609_s14  ;;  %p615_p2 = scmp.lt.s32.totalorder %s609_s14, %s609_s14 }
   0x7   :  { %p616_p3 = por %p615_p2, %p614_p1 }
   0x9   :  { %p617_p4 = pnand %p616_p3, %p610_p0 }
   0xb   :  { %620 = shalt.err (!%p617_p4)
}
   0xc   :  { %s668_s15 = smov 128   ;;  %s669_s16 = smov 8  }
   0xd   :  { %22 = dma.hbm_to_vmem [thread:$0]  %s706_s0, 256, %s17_s13, [#allocation3], %s668_s15, %s668_s15, %s669_s16  }
   0xe   :  { %s670_s19 = smov [#allocation5]  }
   0xf   :  { %s28_s20 = sshll.u32 %s670_s19, 4  ;;  %s29_s20 = int_to_ptr.vmem [resolvable:$true] %s28_s20 }
  0x10   :  { %s629_s21 = scalar_lea.vmem %s29_s20, 6144  ;;  %p634_p6 = scmp.lt.s32.totalorder %s29_s20, %s29_s20 }
  0x11   :  { %p630_p5 = scmp.ne.s32.totalorder %s29_s20, %s629_s21  ;;  %p635_p7 = scmp.lt.s32.totalorder %s629_s21, %s629_s21 }
  0x13   :  { %p636_p8 = por %p635_p7, %p634_p6 }
  0x15   :  { %p637_p9 = pnand %p636_p8, %p630_p5 }
  0x17   :  { %640 = shalt.err (!%p637_p9)
}
  0x18   :  { %34 = dma.hbm_to_vmem [thread:$0]  %s707_s1, 6144, %s29_s20, [#allocation6], %s668_s15, %s668_s15, %s669_s16  }
  0x19   :  { %661 = dma.done.wait [#allocation3], 256  }
  0x1a   :  { %662 = vsyncadd [#allocation3], 4294967040 }
  0x1b   :  { %663 = dma.done.wait [#allocation6], 6144  }
  0x1c   :  { %664 = vsyncadd [#allocation6], 4294961152  ;;  %v526_v0 = vld [vmem:[#allocation5 + $0x74] ss:$8 sps:$4 sm:$0xff]   ;;  %v528_v1 = vld [vmem:[#allocation5 + $0x70] ss:$8 sps:$4 sm:$0xff]   ;;  %v96_v50 = vlaneseq }
  0x1d   :  { %361 = vmatprep.subr.bf16.mxu0 %v526_v0  ;;  %v529_v2 = vld [vmem:[#allocation5 + $0x64] ss:$8 sps:$4 sm:$0xff]   ;;  %v531_v3 = vld [vmem:[#allocation5 + $0x60] ss:$8 sps:$4 sm:$0xff]   ;;  %v532_v4 = vld [vmem:[#allocation5 + $0x54] ss:$8 sps:$4 sm:$0xff]  }
  0x1e   :  { %362 = vmatpush1.bf16.xpose.msra.mxu0 %v528_v1  ;;  %v550_v5 = vld [vmem:[#allocation5 + $0x174] ss:$8 sps:$4 sm:$0xff]   ;;  %v552_v6 = vld [vmem:[#allocation5 + $0x170] ss:$8 sps:$4 sm:$0xff]   ;;  %v556_v7 = vld [vmem:[#allocation5 + $0x164] ss:$8 sps:$4 sm:$0xff]  }
  0x1f   :  { %363 = vmatprep.subr.bf16.mxu0 %v529_v2  ;;  %404 = vmatprep.subr.bf16.mxu1 %v550_v5  ;;  %v534_v8 = vld [vmem:[#allocation5 + $0x50] ss:$8 sps:$4 sm:$0xff]   ;;  %v535_v9 = vld [vmem:[#allocation5 + $0x44] ss:$8 sps:$4 sm:$0xff]   ;;  %v558_v10 = vld [vmem:[#allocation5 + $0x160] ss:$8 sps:$4 sm:$0xff]  }
  0x20   :  { %405 = vmatpush1.bf16.xpose.msra.mxu1 %v552_v6  ;;  %v562_v11 = vld [vmem:[#allocation5 + $0x154] ss:$8 sps:$4 sm:$0xff]   ;;  %v537_v12 = vld [vmem:[#allocation5 + $0x40] ss:$8 sps:$4 sm:$0xff]   ;;  %v564_v14 = vld [vmem:[#allocation5 + $0x150] ss:$8 sps:$4 sm:$0xff]  }
  0x21   :  { %406 = vmatprep.subr.bf16.mxu1 %v556_v7  ;;  %v538_v13 = vld [vmem:[#allocation5 + $0x34] ss:$8 sps:$4 sm:$0xff]   ;;  %v568_v15 = vld [vmem:[#allocation5 + $0x144] ss:$8 sps:$4 sm:$0xff]   ;;  %v540_v16 = vld [vmem:[#allocation5 + $0x30] ss:$8 sps:$4 sm:$0xff]  }
  0x22   :  { %v541_v17 = vld [vmem:[#allocation5 + $0x24] ss:$8 sps:$4 sm:$0xff]   ;;  %v600_v18 = vld [vmem:[#allocation2 + $0x4] ss:$8 sps:$4 sm:$0xff]   ;;  %v570_v19 = vld [vmem:[#allocation5 + $0x140] ss:$8 sps:$4 sm:$0xff]  }
  0x23   :  { %v574_v20 = vld [vmem:[#allocation5 + $0x134] ss:$8 sps:$4 sm:$0xff]   ;;  %436 = vmatprep.mubr.bf16.mxu1 %v600_v18  ;;  %393 = vmatprep.mubr.bf16.mxu0 %v600_v18  ;;  %v543_v21 = vld [vmem:[#allocation5 + $0x20] ss:$8 sps:$4 sm:$0xff]   ;;  %v576_v23 = vld [vmem:[#allocation5 + $0x130] ss:$8 sps:$4 sm:$0xff]  }
  0x24   :  { %v544_v22 = vld [vmem:[#allocation5 + $0x14] ss:$8 sps:$4 sm:$0xff]   ;;  %v580_v24 = vld [vmem:[#allocation5 + $0x124] ss:$8 sps:$4 sm:$0xff]   ;;  %v546_v25 = vld [vmem:[#allocation5 + $0x10] ss:$8 sps:$4 sm:$0xff]  }
  0x25   :  { %v547_v26 = vld [vmem:[#allocation5 + $0x4] ss:$8 sps:$4 sm:$0xff]   ;;  %v582_v27 = vld [vmem:[#allocation5 + $0x120] ss:$8 sps:$4 sm:$0xff]   ;;  %v586_v28 = vld [vmem:[#allocation5 + $0x114] ss:$8 sps:$4 sm:$0xff]  }
  0x26   :  { %364 = vmatpush1.bf16.xpose.msra.mxu0 %v531_v3  ;;  %v549_v29 = vld [vmem:[#allocation5] ss:$8 sps:$4 sm:$0xff]   ;;  %v553_v30 = vld [vmem:[#allocation5 + $0xf4] ss:$8 sps:$4 sm:$0xff]   ;;  %v588_v31 = vld [vmem:[#allocation5 + $0x110] ss:$8 sps:$4 sm:$0xff]  }
  0x27   :  { %365 = vmatprep.subr.bf16.mxu0 %v532_v4  ;;  %v592_v32 = vld [vmem:[#allocation5 + $0x104] ss:$8 sps:$4 sm:$0xff]   ;;  %v555_v33 = vld [vmem:[#allocation5 + $0xf0] ss:$8 sps:$4 sm:$0xff]   ;;  %v594_v35 = vld [vmem:[#allocation5 + $0x100] ss:$8 sps:$4 sm:$0xff]  }
  0x28   :  { %407 = vmatpush1.bf16.xpose.msra.mxu1 %v558_v10  ;;  %v559_v34 = vld [vmem:[#allocation5 + $0xe4] ss:$8 sps:$4 sm:$0xff]   ;;  %v561_v36 = vld [vmem:[#allocation5 + $0xe0] ss:$8 sps:$4 sm:$0xff]   ;;  %v565_v37 = vld [vmem:[#allocation5 + $0xd4] ss:$8 sps:$4 sm:$0xff]  }
  0x29   :  { %408 = vmatprep.subr.bf16.mxu1 %v562_v11  ;;  %v598_v38 = vld [vmem:[#allocation2] ss:$8 sps:$4 sm:$0xff]   ;;  %v571_v40 = vld [vmem:[#allocation5 + $0xc4] ss:$8 sps:$4 sm:$0xff]   ;;  %v573_v41 = vld [vmem:[#allocation5 + $0xc0] ss:$8 sps:$4 sm:$0xff]  }
  0x2a   :  { %v567_v39 = vld [vmem:[#allocation5 + $0xd0] ss:$8 sps:$4 sm:$0xff]   ;;  %v577_v42 = vld [vmem:[#allocation5 + $0xb4] ss:$8 sps:$4 sm:$0xff]   ;;  %v583_v44 = vld [vmem:[#allocation5 + $0xa4] ss:$8 sps:$4 sm:$0xff]  }
  0x2b   :  { %v579_v43 = vld [vmem:[#allocation5 + $0xb0] ss:$8 sps:$4 sm:$0xff]   ;;  %v585_v45 = vld [vmem:[#allocation5 + $0xa0] ss:$8 sps:$4 sm:$0xff]   ;;  %v589_v46 = vld [vmem:[#allocation5 + $0x94] ss:$8 sps:$4 sm:$0xff]  }
  0x2c   :  { %v591_v47 = vld [vmem:[#allocation5 + $0x90] ss:$8 sps:$4 sm:$0xff]   ;;  %v595_v48 = vld [vmem:[#allocation5 + $0x84] ss:$8 sps:$4 sm:$0xff]   ;;  %v597_v49 = vld [vmem:[#allocation5 + $0x80] ss:$8 sps:$4 sm:$0xff]  }
  0x2d   :  { %v97_v51 = vshrl.u32 %v96_v50, 7  ;;  %v94_v53 = vld [vmem:[%s708_s2] sm:$0x7]  ;;  %s671_s24 = smov [#allocation7]  }
  0x2e   :  { %366 = vmatpush1.bf16.xpose.msra.mxu0 %v534_v8  ;;  %s456_s2 = sshll.u32 %s671_s24, 4  ;;  %s457_s2 = int_to_ptr.vmem [resolvable:$true] %s456_s2 }
  0x2f   :  { %367 = vmatprep.subr.bf16.mxu0 %v535_v9  ;;  %v106_v52 = vsub.s32 2, %v97_v51  ;;  %v98_v61 = vsub.s32 0, %v97_v51  ;;  %v102_v62 = vsub.s32 1, %v97_v51  ;;  %s641_s25 = scalar_lea.vmem %s457_s2, 768  ;;  %p646_p11 = scmp.lt.s32.totalorder %s457_s2, %s457_s2 }
  0x30   :  { %409 = vmatpush1.bf16.xpose.msra.mxu1 %v564_v14  ;;  %p642_p10 = scmp.ne.s32.totalorder %s457_s2, %s641_s25  ;;  %p647_p12 = scmp.lt.s32.totalorder %s641_s25, %s641_s25 }
  0x31   :  { %410 = vmatprep.subr.bf16.mxu1 %v568_v15  ;;  %v107_v54 = vrot.slane %v94_v53, %v106_v52  ;;  %v99_v63 = vrot.slane %v94_v53, %v98_v61  ;;  %v103_v0 = vrot.slane %v94_v53, %v102_v62 }
  0x32   :  { %p648_p13 = por %p647_p12, %p646_p11 }
  0x34   :  { %p649_p0 = pnand %p648_p13, %p642_p10 }
  0x36   :  { %368 = vmatpush1.bf16.xpose.msra.mxu0 %v537_v12 }
  0x37   :  { %369 = vmatprep.subr.bf16.mxu0 %v538_v13 }
  0x38   :  { %411 = vmatpush1.bf16.xpose.msra.mxu1 %v570_v19 }
  0x39   :  { %412 = vmatprep.subr.bf16.mxu1 %v574_v20 }
  0x3e   :  { %370 = vmatpush1.bf16.xpose.msra.mxu0 %v540_v16 }
  0x3f   :  { %371 = vmatprep.subr.bf16.mxu0 %v541_v17 }
  0x40   :  { %413 = vmatpush1.bf16.xpose.msra.mxu1 %v576_v23 }
  0x41   :  { %414 = vmatprep.subr.bf16.mxu1 %v580_v24 }
  0x46   :  { %372 = vmatpush1.bf16.xpose.msra.mxu0 %v543_v21 }
  0x47   :  { %373 = vmatprep.subr.bf16.mxu0 %v544_v22 }
  0x48   :  { %415 = vmatpush1.bf16.xpose.msra.mxu1 %v582_v27 }
  0x49   :  { %416 = vmatprep.subr.bf16.mxu1 %v586_v28 }
  0x4e   :  { %374 = vmatpush1.bf16.xpose.msra.mxu0 %v546_v25 }
  0x4f   :  { %375 = vmatprep.subr.bf16.mxu0 %v547_v26 }
  0x50   :  { %417 = vmatpush1.bf16.xpose.msra.mxu1 %v588_v31 }
  0x51   :  { %418 = vmatprep.subr.bf16.mxu1 %v592_v32 }
  0x56   :  { %376 = vmatpush1.bf16.xpose.msra.mxu0 %v549_v29 }
  0x57   :  { %377 = vmatprep.subr.bf16.mxu0 %v553_v30 }
  0x58   :  { %419 = vmatpush1.bf16.xpose.msra.mxu1 %v594_v35 }
  0x5e   :  { %378 = vmatpush2.bf16.xpose.msra.mxu0 %v555_v33 }
  0x5f   :  { %379 = vmatprep.subr.bf16.mxu0 %v559_v34  ;;  %437 = vmatmul.mubr.bf16.vlgmr.msra.gmra.mxu1 %v598_v38 }
  0x66   :  { %380 = vmatpush2.bf16.xpose.msra.mxu0 %v561_v36 }
  0x67   :  { %381 = vmatprep.subr.bf16.mxu0 %v565_v37 }
  0x6e   :  { %382 = vmatpush2.bf16.xpose.msra.mxu0 %v567_v39 }
  0x6f   :  { %383 = vmatprep.subr.bf16.mxu0 %v571_v40 }
  0x76   :  { %384 = vmatpush2.bf16.xpose.msra.mxu0 %v573_v41 }
  0x77   :  { %385 = vmatprep.subr.bf16.mxu0 %v577_v42 }
  0x7e   :  { %386 = vmatpush2.bf16.xpose.msra.mxu0 %v579_v43 }
  0x7f   :  { %387 = vmatprep.subr.bf16.mxu0 %v583_v44 }
  0x86   :  { %388 = vmatpush2.bf16.xpose.msra.mxu0 %v585_v45 }
  0x87   :  { %389 = vmatprep.subr.bf16.mxu0 %v589_v46 }
  0x8e   :  { %390 = vmatpush2.bf16.xpose.msra.mxu0 %v591_v47 }
  0x8f   :  { %391 = vmatprep.subr.bf16.mxu0 %v595_v48 }
  0x96   :  { %392 = vmatpush2.bf16.xpose.msra.mxu0 %v597_v49 }
  0x9d   :  { %394 = vmatmul.mubr.bf16.vlgmr.msra.gmra.mxu0 %v598_v38 }
 0x11f   :  { %v438_v55 = vpop.f32.mrf.mxu1 }
 0x120   :  { %v439_v56 = vadd.f32 %v438_v55, %v107_v54 }
 0x121   :  { %v440_v57 = vpop.f32.mrf.mxu1 }
 0x122   :  { %447 = vst [vmem:[#allocation7 + $0x10] sm:$0xff] %v439_v56 }
 0x123   :  { %v441_v58 = vpop.f32.mrf.mxu1 }
 0x124   :  { %v442_v59 = vadd.f32 %v441_v58, %v107_v54 }
 0x125   :  { %v443_v60 = vpop.f32.mrf.mxu1 }
 0x126   :  { %450 = vst [vmem:[#allocation7 + $0x28] sm:$0xff] %v442_v59 }
 0x15d   :  { %v395_v1 = vpop.f32.mrf.mxu0 }
 0x15e   :  { %v396_v2 = vadd.f32 %v395_v1, %v99_v63 }
 0x15f   :  { %v397_v3 = vpop.f32.mrf.mxu0 }
 0x160   :  { %445 = vst [vmem:[#allocation7] sm:$0xff] %v396_v2  ;;  %v398_v4 = vadd.f32 %v397_v3, %v103_v0 }
 0x161   :  { %v399_v5 = vpop.f32.mrf.mxu0 }
 0x162   :  { %446 = vst [vmem:[#allocation7 + $0x8] sm:$0xff] %v398_v4  ;;  %v400_v6 = vadd.f32 %v399_v5, %v99_v63 }
 0x163   :  { %v401_v7 = vpop.f32.mrf.mxu0 }
 0x164   :  { %448 = vst [vmem:[#allocation7 + $0x18] sm:$0xff] %v400_v6  ;;  %v402_v8 = vadd.f32 %v401_v7, %v103_v0 }
 0x166   :  { %449 = vst [vmem:[#allocation7 + $0x20] sm:$0xff] %v402_v8 }
 0x167   :  { %652 = shalt.err (!%p649_p0)
}
 0x168   :  { %s672_s26 = smov 384   ;;  %s673_s27 = smov 24  }
 0x169   :  { %462 = dma.vmem_to_hbm [thread:$0]  %s457_s2, 768, %s709_s3, [#allocation4], %s672_s26, %s672_s26, %s673_s27  }
 0x16a   :  { %665 = dma.done.wait [#allocation4], 768  }
 0x16b   :  { %666 = vsyncadd [#allocation4], 4294966528 }
 0x16c   :  { %466 = vsyncpa [#allocation3], 1 }
 0x16d   :  { %467 = vsyncpa [#allocation6], 1 }
 0x16e   :  { %468 = vsyncpa [#allocation4], 1 }

</bundles_post_ra>
